<compile_context>
chip_gen: v6e
topology: v6e:2x2x1
jax: 0.10.0
libtpu: 0.0.40
codegen_flags: <defaults>
</compile_context>

<pallas_src>
import functools
import math

import numpy as np
import jax
import jax.numpy as jnp
from jax import lax
from jax.experimental import pallas as pl
from jax.experimental.pallas import tpu as pltpu


# ----------------------------------------------------------------------------
# Helpers
# ----------------------------------------------------------------------------

def _pick_tile(n, cap, mult=8):
    """Largest divisor of `n` that is <= cap and a multiple of `mult`.

    Falls back to `n` itself (the full dimension, always legal for a BlockSpec).
    """
    for d in range(min(n, cap), 0, -1):
        if n % d == 0 and (d % mult == 0 or d == n):
            return d
    return n


def _vmem_budget_bytes():
    """Generation-aware scoped-VMEM budget (~3/4 of per-core physical VMEM)."""
    cap = None
    try:
        cap = getattr(pltpu.get_tpu_info(), "vmem_capacity_bytes", None)
    except Exception:
        cap = None
    if not cap:
        cap = 64 * 1024 * 1024          # conservative default (v7x per-TC VMEM)
    return int(min(cap * 3 // 4, 100 * 1024 * 1024))


# ----------------------------------------------------------------------------
# Kernel 1: fused K/V linear projections (batch*seq folded into the M dim)
# ----------------------------------------------------------------------------

def _kv_project_kernel(k_ref, v_ref, wk_ref, bk_ref, wv_ref, bv_ref,
                       kp_ref, vp_ref, *, mxu_dtype):
    k = k_ref[...].astype(mxu_dtype)
    v = v_ref[...].astype(mxu_dtype)
    kp = jnp.dot(k, wk_ref[...], preferred_element_type=jnp.float32) + bk_ref[...]
    vp = jnp.dot(v, wv_ref[...], preferred_element_type=jnp.float32) + bv_ref[...]
    kp_ref[...] = kp.astype(kp_ref.dtype)
    vp_ref[...] = vp.astype(vp_ref.dtype)


def _kv_project(key_p, value_p, wk_t, bk, wv_t, bv, *,
                mxu_dtype, proj_dtype, vmem_limit):
    B, Sk_pad, H = key_p.shape
    A = wk_t.shape[1]
    M = B * Sk_pad
    k2 = key_p.reshape(M, H)
    v2 = value_p.reshape(M, H)
    tm = _pick_tile(M, 1024 if vmem_limit >= 72 * 2**20 else 512, mult=8)

    # TODO(synk): for very large hidden sizes the (H, H) value weight block
    #             should itself be tiled along H.
    kp, vp = pl.pallas_call(
        functools.partial(_kv_project_kernel, mxu_dtype=mxu_dtype),
        out_shape=(jax.ShapeDtypeStruct((M, A), proj_dtype),
                   jax.ShapeDtypeStruct((M, H), proj_dtype)),
        grid_spec=pltpu.PrefetchScalarGridSpec(
            num_scalar_prefetch=0,
            grid=(M // tm,),
            in_specs=[
                pl.BlockSpec((tm, H), lambda i: (i, 0)),      # key rows
                pl.BlockSpec((tm, H), lambda i: (i, 0)),      # value rows
                pl.BlockSpec((H, A), lambda i: (0, 0)),       # Wk^T (resident)
                pl.BlockSpec((1, A), lambda i: (0, 0)),       # bk
                pl.BlockSpec((H, H), lambda i: (0, 0)),       # Wv^T (resident)
                pl.BlockSpec((1, H), lambda i: (0, 0)),       # bv
            ],
            out_specs=(pl.BlockSpec((tm, A), lambda i: (i, 0)),
                       pl.BlockSpec((tm, H), lambda i: (i, 0))),
        ),
        compiler_params=pltpu.CompilerParams(
            dimension_semantics=("parallel",),
            vmem_limit_bytes=vmem_limit,
        ),
    )(k2, v2,
      wk_t.astype(mxu_dtype), bk.reshape(1, A).astype(jnp.float32),
      wv_t.astype(mxu_dtype), bv.reshape(1, H).astype(jnp.float32))
    return kp.reshape(B, Sk_pad, A), vp.reshape(B, Sk_pad, H)


# ----------------------------------------------------------------------------
# Kernel 2: fused Q projection + QK^T + softmax + PV
# ----------------------------------------------------------------------------

def _attention_kernel(*refs, inv_scale, sk_valid, mxu_dtype, has_mask):
    if has_mask:
        q_ref, kp_ref, vp_ref, wq_ref, bq_ref, mask_ref, out_ref, attn_ref = refs
    else:
        q_ref, kp_ref, vp_ref, wq_ref, bq_ref, out_ref, attn_ref = refs
        mask_ref = None

    Bt, tq, H = q_ref.shape
    Sk_pad = kp_ref.shape[1]
    A = wq_ref.shape[1]

    # Q projection: fold the batch block into the matmul M dimension, bf16 MXU
    # operands (when the model dtype is f32) with f32 accumulation.
    q2 = q_ref[...].reshape(Bt * tq, H).astype(mxu_dtype)
    Q = jnp.dot(q2, wq_ref[...], preferred_element_type=jnp.float32)
    Q = (Q + bq_ref[...]) * inv_scale                # fold 1/sqrt(A) into Q
    Q = Q.reshape(Bt, tq, A).astype(mxu_dtype)

    # energy[b, i, j] = sum_a Q[b, i, a] * K[b, j, a]; no materialized K^T.
    energy = lax.dot_general(
        Q, kp_ref[...],
        dimension_numbers=(((2,), (2,)), ((0,), (0,))),
        preferred_element_type=jnp.float32)

    if has_mask:
        # PyTorch semantics: energy.masked_fill(mask == 0, -1e10).
        energy = jnp.where(mask_ref[...] == 0, jnp.float32(-1e10), energy)
    if sk_valid != Sk_pad:
        # Zero-padded key columns (lane padding to a multiple of 128): cheap
        # (1, 1, Sk_pad) additive bias instead of a full-energy-shaped where.
        col = lax.broadcasted_iota(jnp.int32, (1, 1, Sk_pad), 2)
        energy = energy + jnp.where(col < sk_valid, 0.0, -1e30).astype(jnp.float32)

    # Numerically stable softmax over the key axis, all in f32. Exact division
    # so the returned attention rows sum to 1 (PyTorch parity).
    m = jnp.max(energy, axis=-1, keepdims=True)
    e = jnp.exp(energy - m)
    attention = e / jnp.sum(e, axis=-1, keepdims=True)

    # PV matmul: bf16 operands, f32 accumulation.
    out = lax.dot_general(
        attention.astype(mxu_dtype), vp_ref[...],
        dimension_numbers=(((2,), (1,)), ((0,), (0,))),
        preferred_element_type=jnp.float32)

    out_ref[...] = out.astype(out_ref.dtype)
    attn_ref[...] = attention.astype(attn_ref.dtype)


# ----------------------------------------------------------------------------
# Wrapper
# ----------------------------------------------------------------------------

def attention_forward(query, key, value, params, mask=None, *,
                      block_q=None, attn_dtype=None, use_bf16_mxu=True):
    """query: [B, Sq, H], key/value: [B, Sk, H]. Returns (output, attention).

    mask: optional, broadcastable to [B, Sq, Sk]; positions where mask == 0 are
    filled with -1e10 before the softmax (PyTorch masked_fill semantics).
    attn_dtype: dtype of the returned attention matrix (default query.dtype);
    pass jnp.bfloat16 to halve the dominant HBM writeback for f32 models.
    """
    B, Sq, H = query.shape
    Sk = key.shape[1]
    assert H % 2 == 0, "hidden_size must be even (attention_hidden_size = H // 2)"
    A = H // 2
    inv_scale = 1.0 / math.sqrt(float(A))

    wq_t, bq, wk_t, bk, wv_t, bv = params   # wq_t:(H,A) wk_t:(H,A) wv_t:(H,H)

    in_dtype = query.dtype
    mxu_dtype = jnp.bfloat16 if (use_bf16_mxu and in_dtype == jnp.float32) else in_dtype
    proj_dtype = mxu_dtype                  # projected K/V feed the MXU directly
    attn_dtype = in_dtype if attn_dtype is None else attn_dtype

    budget = _vmem_budget_bytes()

    # Pad the key sequence to a multiple of 128 so the (.., Sk) attention
    # writeback is a lane-dense store; padded columns are masked in-kernel and
    # sliced off afterwards.
    Sk_pad = ((Sk + 127) // 128) * 128
    if Sk_pad != Sk:
        pad = [(0, 0), (0, Sk_pad - Sk), (0, 0)]
        key_p, value_p = jnp.pad(key, pad), jnp.pad(value, pad)
    else:
        key_p, value_p = key, value

    # K/V projections computed exactly once (not once per query tile).
    k_proj, v_proj = _kv_project(key_p, value_p, wk_t, bk, wv_t, bv,
                                 mxu_dtype=mxu_dtype, proj_dtype=proj_dtype,
                                 vmem_limit=budget)

    # Optional user mask: padded key columns stay "valid" here and are killed
    # by the -1e30 pad bias, so an all-masked row still matches torch.softmax.
    has_mask = mask is not None
    if has_mask:
        mask_f = jnp.broadcast_to(mask != 0, (B, Sq, Sk)).astype(jnp.float32)
        if Sk_pad != Sk:
            mask_f = jnp.pad(mask_f, [(0, 0), (0, 0), (0, Sk_pad - Sk)],
                             constant_values=1.0)

    # Generation-aware tiling of (batch-block, query-tile).
    in_bytes = np.dtype(in_dtype).itemsize
    proj_bytes = np.dtype(proj_dtype).itemsize
    attn_bytes = np.dtype(attn_dtype).itemsize
    block_q_cap = block_q if block_q is not None else (512 if budget >= 72 * 2**20 else 256)
    tq = _pick_tile(Sq, block_q_cap, mult=8)
    Bt = _pick_tile(B, max(1, 256 // tq), mult=1) if tq < 256 else 1

    def footprint(bt, t):
        fp = 2 * bt * t * H * in_bytes                    # query tile (2x buffered)
        fp += 2 * bt * Sk_pad * (A + H) * proj_bytes      # projected K / V blocks
        fp += 2 * (H * A * proj_bytes + A * 4)            # Wq^T, bq (VMEM resident)
        fp += 2 * bt * t * H * in_bytes                   # output tile
        fp += 2 * bt * t * Sk_pad * attn_bytes            # attention tile
        if has_mask:
            fp += 2 * bt * t * Sk_pad * 4                 # mask tile
        fp += 3 * bt * t * Sk_pad * 4 + 2 * bt * t * A * 4  # f32 temporaries
        return fp

    while footprint(Bt, tq) > budget:
        if Bt > 1:
            nbt = _pick_tile(B, Bt - 1, mult=1)
            if nbt < Bt:
                Bt = nbt
                continue
        ntq = _pick_tile(Sq, tq - 1, mult=8) if tq > 8 else tq
        if ntq < tq:
            tq = ntq
            continue
        break  # TODO(synk): Sk tiling (flash / two-pass) for very long keys.

    kernel = functools.partial(_attention_kernel, inv_scale=inv_scale,
                               sk_valid=Sk, mxu_dtype=mxu_dtype,
                               has_mask=has_mask)

    grid = (B // Bt, Sq // tq)
    in_specs = [
        pl.BlockSpec((Bt, tq, H), lambda b, q: (b, q, 0)),       # query tile
        pl.BlockSpec((Bt, Sk_pad, A), lambda b, q: (b, 0, 0)),   # projected K
        pl.BlockSpec((Bt, Sk_pad, H), lambda b, q: (b, 0, 0)),   # projected V
        pl.BlockSpec((H, A), lambda b, q: (0, 0)),               # Wq^T (resident)
        pl.BlockSpec((1, A), lambda b, q: (0, 0)),               # bq
    ]
    args = [query, k_proj, v_proj,
            wq_t.astype(mxu_dtype), bq.reshape(1, A).astype(jnp.float32)]
    if has_mask:
        in_specs.append(pl.BlockSpec((Bt, tq, Sk_pad), lambda b, q: (b, q, 0)))
        args.append(mask_f)

    out, attn = pl.pallas_call(
        kernel,
        out_shape=(jax.ShapeDtypeStruct((B, Sq, H), in_dtype),
                   jax.ShapeDtypeStruct((B, Sq, Sk_pad), attn_dtype)),
        grid_spec=pltpu.PrefetchScalarGridSpec(
            num_scalar_prefetch=0,
            grid=grid,
            in_specs=in_specs,
            out_specs=(pl.BlockSpec((Bt, tq, H), lambda b, q: (b, q, 0)),
                       pl.BlockSpec((Bt, tq, Sk_pad), lambda b, q: (b, q, 0))),
        ),
        compiler_params=pltpu.CompilerParams(
            dimension_semantics=("parallel", "parallel"),
            vmem_limit_bytes=budget,
        ),
    )(*args)

    if Sk_pad != Sk:
        attn = attn[..., :Sk]
    return out, attn


# ----------------------------------------------------------------------------
# Params / reference
# ----------------------------------------------------------------------------

def init_params(key, hidden_size):
    """Deterministic init mirroring nn.Linear shapes.

    PyTorch stores Linear weight as (out, in); we store the transpose (in, out)
    so the kernels compute x @ W_t + b, which equals x @ W.T + b.
    """
    A = hidden_size // 2
    ks = jax.random.split(key, 6)

    def uniform(k, shape, fan_in):
        bound = 1.0 / math.sqrt(fan_in)
        return jax.random.uniform(k, shape, jnp.float32, -bound, bound)

    wq_t = uniform(ks[0], (hidden_size, A), hidden_size)
    bq = uniform(ks[1], (A,), hidden_size)
    wk_t = uniform(ks[2], (hidden_size, A), hidden_size)
    bk = uniform(ks[3], (A,), hidden_size)
    wv_t = uniform(ks[4], (hidden_size, hidden_size), hidden_size)
    bv = uniform(ks[5], (hidden_size,), hidden_size)
    return (wq_t, bq, wk_t, bk, wv_t, bv)


def _reference(query, key, value, params, mask=None):
    """Pure-JAX reference for correctness check."""
    wq_t, bq, wk_t, bk, wv_t, bv = params
    A = wq_t.shape[1]
    Q = query @ wq_t + bq
    K = key @ wk_t + bk
    V = value @ wv_t + bv
    energy = jnp.einsum("bqa,bka->bqk", Q, K) / jnp.sqrt(jnp.float32(A))
    if mask is not None:
        energy = jnp.where(mask == 0, jnp.float32(-1e10), energy)
    attn = jax.nn.softmax(energy, axis=-1)
    out = jnp.einsum("bqk,bkh->bqh", attn, V)
    return out, attn


if __name__ == "__main__":
    B, Sq, Sk, H = 2, 8, 8, 32

    root = jax.random.PRNGKey(0)
    kq, kk, kv, kp, km = jax.random.split(root, 5)
    query = jax.random.normal(kq, (B, Sq, H), jnp.float32)
    key = jax.random.normal(kk, (B, Sk, H), jnp.float32)
    value = jax.random.normal(kv, (B, Sk, H), jnp.float32)
    params = init_params(kp, H)

    ref_out, ref_attn = _reference(query, key, value, params)

    # 1) f32 MXU path (use_bf16_mxu=False). Residual differences come only from
    #    matmul accumulation/precision handling, not the kernel structure.
    out, attn = attention_forward(query, key, value, params, use_bf16_mxu=False)
    out = jax.block_until_ready(out)
    attn = jax.block_until_ready(attn)
    assert out.shape == (B, Sq, H) and attn.shape == (B, Sq, Sk)
    assert jnp.allclose(out, ref_out, atol=1e-2, rtol=1e-2), \
        float(jnp.max(jnp.abs(out - ref_out)))
    assert jnp.allclose(attn, ref_attn, atol=1e-2, rtol=1e-2), \
        float(jnp.max(jnp.abs(attn - ref_attn)))
    # softmax rows sum to 1 (exact division, no approx reciprocal).
    assert jnp.allclose(jnp.sum(attn, axis=-1), 1.0, atol=1e-5, rtol=1e-5)

    # 2) Default fast path: bf16 MXU operands, f32 accumulation + f32 softmax.
    out_b, attn_b = attention_forward(query, key, value, params)
    out_b = jax.block_until_ready(out_b)
    assert jnp.allclose(out_b, ref_out, atol=3e-2, rtol=3e-2), \
        float(jnp.max(jnp.abs(out_b - ref_out)))
    assert jnp.allclose(attn_b, ref_attn, atol=3e-2, rtol=3e-2), \
        float(jnp.max(jnp.abs(attn_b - ref_attn)))

    # 3) Optional mask (masked_fill(mask == 0, -1e10) semantics).
    mask = (jax.random.uniform(km, (B, Sq, Sk)) > 0.3).astype(jnp.int32)
    out_m, attn_m = attention_forward(query, key, value, params, mask=mask,
                                      use_bf16_mxu=False)
    out_m = jax.block_until_ready(out_m)
    ref_out_m, ref_attn_m = _reference(query, key, value, params, mask=mask)
    assert jnp.allclose(out_m, ref_out_m, atol=1e-2, rtol=1e-2), \
        float(jnp.max(jnp.abs(out_m - ref_out_m)))
    assert jnp.allclose(attn_m, ref_attn_m, atol=1e-2, rtol=1e-2), \
        float(jnp.max(jnp.abs(attn_m - ref_attn_m)))

    print("KERNEL_OK")
</pallas_src>

<mosaic_0001>
module attributes {stable_mosaic.version = 11 : i64} {
  func.func @_kv_project_kernel(%arg0: i32, %arg1: memref<256x32xf32, #tpu.memory_space<vmem>>, %arg2: memref<256x32xf32, #tpu.memory_space<vmem>>, %arg3: memref<32x16xf32, #tpu.memory_space<vmem>>, %arg4: memref<1x16xf32, #tpu.memory_space<vmem>>, %arg5: memref<32x32xf32, #tpu.memory_space<vmem>>, %arg6: memref<1x32xf32, #tpu.memory_space<vmem>>, %arg7: memref<256x16xf32, #tpu.memory_space<vmem>>, %arg8: memref<256x32xf32, #tpu.memory_space<vmem>>) attributes {dimension_semantics = [#tpu.dimension_semantics<parallel>], iteration_bounds = array<i64: 1>, scalar_prefetch = 0 : i64, scratch_operands = 0 : i64, tpu.core_type = #tpu.core_type<tc>, window_params = [{transform_indices = @transform_0, window_bounds = array<i64: 256, 32>}, {transform_indices = @transform_1, window_bounds = array<i64: 256, 32>}, {pipeline_mode = #tpu.pipeline_mode<synchronous>, transform_indices = @transform_2, window_bounds = array<i64: 32, 16>}, {pipeline_mode = #tpu.pipeline_mode<synchronous>, transform_indices = @transform_3, window_bounds = array<i64: 1, 16>}, {pipeline_mode = #tpu.pipeline_mode<synchronous>, transform_indices = @transform_4, window_bounds = array<i64: 32, 32>}, {pipeline_mode = #tpu.pipeline_mode<synchronous>, transform_indices = @transform_5, window_bounds = array<i64: 1, 32>}, {transform_indices = @transform_6, window_bounds = array<i64: 256, 16>}, {transform_indices = @transform_7, window_bounds = array<i64: 256, 32>}]} {
    %c0 = arith.constant 0 : index
    %c0_0 = arith.constant 0 : index
    %0 = vector.load %arg1[%c0, %c0_0] : memref<256x32xf32, #tpu.memory_space<vmem>>, vector<256x32xf32>
    %c0_1 = arith.constant 0 : index
    %c0_2 = arith.constant 0 : index
    %1 = vector.load %arg2[%c0_1, %c0_2] : memref<256x32xf32, #tpu.memory_space<vmem>>, vector<256x32xf32>
    %c0_3 = arith.constant 0 : index
    %c0_4 = arith.constant 0 : index
    %2 = vector.load %arg3[%c0_3, %c0_4] : memref<32x16xf32, #tpu.memory_space<vmem>>, vector<32x16xf32>
    %cst = arith.constant dense<0.000000e+00> : vector<256x16xf32>
    %3 = tpu.matmul %0, %2, %cst {dimension_numbers = #tpu.dot_dimension_numbers<[1], [0], [0], [1], [0, 0, 1, 1], [], []>} : vector<256x32xf32>, vector<32x16xf32>, vector<256x16xf32> -> vector<256x16xf32>
    %c0_5 = arith.constant 0 : index
    %c0_6 = arith.constant 0 : index
    %4 = vector.load %arg4[%c0_5, %c0_6] : memref<1x16xf32, #tpu.memory_space<vmem>>, vector<1x16xf32>
    %5 = vector.broadcast %4 : vector<1x16xf32> to vector<256x16xf32>
    %6 = arith.addf %3, %5 : vector<256x16xf32>
    %c0_7 = arith.constant 0 : index
    %c0_8 = arith.constant 0 : index
    %7 = vector.load %arg5[%c0_7, %c0_8] : memref<32x32xf32, #tpu.memory_space<vmem>>, vector<32x32xf32>
    %cst_9 = arith.constant dense<0.000000e+00> : vector<256x32xf32>
    %8 = tpu.matmul %1, %7, %cst_9 {dimension_numbers = #tpu.dot_dimension_numbers<[1], [0], [0], [1], [0, 0, 1, 1], [], []>} : vector<256x32xf32>, vector<32x32xf32>, vector<256x32xf32> -> vector<256x32xf32>
    %c0_10 = arith.constant 0 : index
    %c0_11 = arith.constant 0 : index
    %9 = vector.load %arg6[%c0_10, %c0_11] : memref<1x32xf32, #tpu.memory_space<vmem>>, vector<1x32xf32>
    %10 = vector.broadcast %9 : vector<1x32xf32> to vector<256x32xf32>
    %11 = arith.addf %8, %10 : vector<256x32xf32>
    %c0_12 = arith.constant 0 : index
    %c0_13 = arith.constant 0 : index
    %12 = vector.load %arg7[%c0_12, %c0_13] : memref<256x16xf32, #tpu.memory_space<vmem>>, vector<256x16xf32>
    tpu.vector_store %arg7[%c0_12, %c0_13], %6 {strides = array<i32>} : memref<256x16xf32, #tpu.memory_space<vmem>>, vector<256x16xf32>,
    %c0_14 = arith.constant 0 : index
    %c0_15 = arith.constant 0 : index
    %13 = vector.load %arg8[%c0_14, %c0_15] : memref<256x32xf32, #tpu.memory_space<vmem>>, vector<256x32xf32>
    tpu.vector_store %arg8[%c0_14, %c0_15], %11 {strides = array<i32>} : memref<256x32xf32, #tpu.memory_space<vmem>>, vector<256x32xf32>,
    return
  }
  func.func @transform_0(%arg0: i32) -> (i32, i32) {
    %c0_i32 = arith.constant 0 : i32
    %c0_i32_0 = arith.constant 0 : i32
    return %arg0, %c0_i32 : i32, i32
  }
  func.func @transform_1(%arg0: i32) -> (i32, i32) {
    %c0_i32 = arith.constant 0 : i32
    %c0_i32_0 = arith.constant 0 : i32
    return %arg0, %c0_i32 : i32, i32
  }
  func.func @transform_2(%arg0: i32) -> (i32, i32) {
    %c0_i32 = arith.constant 0 : i32
    %c0_i32_0 = arith.constant 0 : i32
    %c0_i32_1 = arith.constant 0 : i32
    return %c0_i32, %c0_i32_0 : i32, i32
  }
  func.func @transform_3(%arg0: i32) -> (i32, i32) {
    %c0_i32 = arith.constant 0 : i32
    %c0_i32_0 = arith.constant 0 : i32
    %c0_i32_1 = arith.constant 0 : i32
    return %c0_i32, %c0_i32_0 : i32, i32
  }
  func.func @transform_4(%arg0: i32) -> (i32, i32) {
    %c0_i32 = arith.constant 0 : i32
    %c0_i32_0 = arith.constant 0 : i32
    %c0_i32_1 = arith.constant 0 : i32
    return %c0_i32, %c0_i32_0 : i32, i32
  }
  func.func @transform_5(%arg0: i32) -> (i32, i32) {
    %c0_i32 = arith.constant 0 : i32
    %c0_i32_0 = arith.constant 0 : i32
    %c0_i32_1 = arith.constant 0 : i32
    return %c0_i32, %c0_i32_0 : i32, i32
  }
  func.func @transform_6(%arg0: i32) -> (i32, i32) {
    %c0_i32 = arith.constant 0 : i32
    %c0_i32_0 = arith.constant 0 : i32
    return %arg0, %c0_i32 : i32, i32
  }
  func.func @transform_7(%arg0: i32) -> (i32, i32) {
    %c0_i32 = arith.constant 0 : i32
    %c0_i32_0 = arith.constant 0 : i32
    return %arg0, %c0_i32 : i32, i32
  }
}

</mosaic_0001>

<bundles_post_ra>
// kernel: tpu_custom_call.1
= control target key start
LH: loop header
LB: loop body
LE: loop exit
PB: predicated region body
PF: predicated region fallthrough
CT: control target
= control target key end

     0   :  { %vm100_vm0 = vcmask 261120   ;;  %vm754_vm1 = vcmask 130048   ;;  %s1727_s2 = inlined_call_operand.vmem [shape: f32[32,16], index: 2, kind: input, shape index: {}]   ;;  %s1728_s4 = inlined_call_operand.vmem [shape: f32[32,32], index: 4, kind: input, shape index: {}]   ;;  %s1729_s0 = inlined_call_operand.vmem [shape: f32[256,32], index: 0, kind: input, shape index: {}]   ;;  %s1730_s1 = inlined_call_operand.vmem [shape: f32[256,32], index: 1, kind: input, shape index: {}]   ;;  %s1731_s3 = inlined_call_operand.vmem [shape: f32[1,16], index: 3, kind: input, shape index: {}]   ;;  %s1732_s5 = inlined_call_operand.vmem [shape: f32[1,32], index: 5, kind: input, shape index: {}]   ;;  %s1733_s6 = inlined_call_operand.vmem [shape: f32[256,16], index: 6, kind: output, shape index: {0}]   ;;  %s1734_s7 = inlined_call_operand.vmem [shape: f32[256,32], index: 7, kind: output, shape index: {1}]  }
   0x1   :  { %v92_v0 = vld [vmem:[%s1727_s2 + $0x18] sm:$0xff]  ;;  %v91_v2 = vld [vmem:[%s1727_s2 + $0x10] sm:$0xff]  ;;  %v90_v4 = vld [vmem:[%s1727_s2 + $0x8] sm:$0xff] }
   0x2   :  { %v425_v1 = vld [vmem:[%s1728_s4 + $0x18] sm:$0xff]  ;;  %965 = vmatprep.subr.mxu0 %v92_v0  ;;  %v424_v3 = vld [vmem:[%s1728_s4 + $0x10] sm:$0xff]  ;;  %v423_v5 = vld [vmem:[%s1728_s4 + $0x8] sm:$0xff] }
   0x3   :  { %1021 = vmatprep.subr.mxu1 %v425_v1  ;;  %966 = vmatpush3.msra.mxu0 %v92_v0  ;;  %v89_v6 = vld [vmem:[%s1727_s2] sm:$0xff]  ;;  %v26_v10 = vld [vmem:[%s1729_s0 + $0x8] sm:$0xff]  ;;  %v27_v12 = vld [vmem:[%s1729_s0 + $0x10] sm:$0xff] }
   0x4   :  { %1022 = vmatpush3.msra.mxu1 %v425_v1  ;;  %967 = vmatprep.subr.mxu0 %v91_v2  ;;  %v422_v7 = vld [vmem:[%s1728_s4] sm:$0xff]  ;;  %v58_v11 = vld [vmem:[%s1730_s1 + $0x8] sm:$0xff]  ;;  %v59_v13 = vld [vmem:[%s1730_s1 + $0x10] sm:$0xff] }
   0x5   :  { %1023 = vmatprep.subr.mxu1 %v424_v3  ;;  %968 = vmatpush3.msra.mxu0 %v91_v2  ;;  %v25_v8 = vld [vmem:[%s1729_s0] sm:$0xff]  ;;  %v28_v14 = vld [vmem:[%s1729_s0 + $0x18] sm:$0xff]  ;;  %v30_v18 = vld [vmem:[%s1729_s0 + $0x28] sm:$0xff] }
   0x6   :  { %1024 = vmatpush3.msra.mxu1 %v424_v3  ;;  %969 = vmatprep.subr.mxu0 %v90_v4  ;;  %v57_v9 = vld [vmem:[%s1730_s1] sm:$0xff]  ;;  %v60_v15 = vld [vmem:[%s1730_s1 + $0x18] sm:$0xff]  ;;  %v62_v19 = vld [vmem:[%s1730_s1 + $0x28] sm:$0xff] }
   0x7   :  { %1025 = vmatprep.subr.mxu1 %v423_v5  ;;  %970 = vmatpush3.msra.mxu0 %v90_v4  ;;  %v29_v16 = vld [vmem:[%s1729_s0 + $0x20] sm:$0xff]  ;;  %v31_v20 = vld [vmem:[%s1729_s0 + $0x30] sm:$0xff]  ;;  %v32_v22 = vld [vmem:[%s1729_s0 + $0x38] sm:$0xff] }
   0x8   :  { %1026 = vmatpush3.msra.mxu1 %v423_v5  ;;  %971 = vmatprep.subr.mxu0 %v89_v6  ;;  %v61_v17 = vld [vmem:[%s1730_s1 + $0x20] sm:$0xff]  ;;  %v63_v21 = vld [vmem:[%s1730_s1 + $0x30] sm:$0xff]  ;;  %v64_v23 = vld [vmem:[%s1730_s1 + $0x38] sm:$0xff] }
   0x9   :  { %1027 = vmatprep.subr.mxu1 %v422_v7  ;;  %972 = vmatpush3.msra.mxu0 %v89_v6  ;;  %v33_v24 = vld [vmem:[%s1729_s0 + $0x40] sm:$0xff]  ;;  %v34_v26 = vld [vmem:[%s1729_s0 + $0x48] sm:$0xff]  ;;  %v35_v28 = vld [vmem:[%s1729_s0 + $0x50] sm:$0xff] }
   0xa   :  { %973 = vmatprep.mubr.msk.f32.mxu0 %vm100_vm0, %v25_v8  ;;  %1028 = vmatpush3.msra.mxu1 %v422_v7  ;;  %v65_v25 = vld [vmem:[%s1730_s1 + $0x40] sm:$0xff]  ;;  %v66_v27 = vld [vmem:[%s1730_s1 + $0x48] sm:$0xff]  ;;  %v67_v29 = vld [vmem:[%s1730_s1 + $0x50] sm:$0xff] }
   0xb   :  { %1029 = vmatprep.mubr.msk.f32.mxu1 %vm100_vm0, %v57_v9  ;;  %974 = vmatmul.mubr.msk.f32.vlgmr.msra.gmra.mxu0 %vm100_vm0, %v26_v10  ;;  %v36_v30 = vld [vmem:[%s1729_s0 + $0x58] sm:$0xff]  ;;  %v37_v32 = vld [vmem:[%s1729_s0 + $0x60] sm:$0xff]  ;;  %v38_v34 = vld [vmem:[%s1729_s0 + $0x68] sm:$0xff] }
   0xc   :  { %1030 = vmatmul.mubr.msk.f32.vlgmr.msra.gmra.mxu1 %vm100_vm0, %v58_v11  ;;  %976 = vmatprep.mubr.msk.f32.mxu0 %vm100_vm0, %v27_v12  ;;  %v68_v31 = vld [vmem:[%s1730_s1 + $0x58] sm:$0xff]  ;;  %v69_v33 = vld [vmem:[%s1730_s1 + $0x60] sm:$0xff]  ;;  %v70_v35 = vld [vmem:[%s1730_s1 + $0x68] sm:$0xff] }
   0xd   :  { %1032 = vmatprep.mubr.msk.f32.mxu1 %vm100_vm0, %v59_v13  ;;  %v39_v36 = vld [vmem:[%s1729_s0 + $0x70] sm:$0xff]  ;;  %v40_v38 = vld [vmem:[%s1729_s0 + $0x78] sm:$0xff]  ;;  %v41_v40 = vld [vmem:[%s1729_s0 + $0x80] sm:$0xff] }
   0xe   :  { %v71_v37 = vld [vmem:[%s1730_s1 + $0x70] sm:$0xff]  ;;  %v72_v39 = vld [vmem:[%s1730_s1 + $0x78] sm:$0xff]  ;;  %v73_v41 = vld [vmem:[%s1730_s1 + $0x80] sm:$0xff] }
   0xf   :  { %977 = vmatmul.mubr.msk.f32.gmra.mxu0 %vm100_vm0, %v28_v14  ;;  %v42_v42 = vld [vmem:[%s1729_s0 + $0x88] sm:$0xff]  ;;  %v43_v44 = vld [vmem:[%s1729_s0 + $0x90] sm:$0xff]  ;;  %v44_v46 = vld [vmem:[%s1729_s0 + $0x98] sm:$0xff] }
  0x10   :  { %1033 = vmatmul.mubr.msk.f32.gmra.mxu1 %vm100_vm0, %v60_v15  ;;  %979 = vmatprep.mubr.msk.f32.mxu0 %vm100_vm0, %v29_v16  ;;  %v74_v43 = vld [vmem:[%s1730_s1 + $0x88] sm:$0xff]  ;;  %v75_v45 = vld [vmem:[%s1730_s1 + $0x90] sm:$0xff]  ;;  %v76_v47 = vld [vmem:[%s1730_s1 + $0x98] sm:$0xff] }
  0x11   :  { %1035 = vmatprep.mubr.msk.f32.mxu1 %vm100_vm0, %v61_v17  ;;  %v45_v48 = vld [vmem:[%s1729_s0 + $0xa0] sm:$0xff]  ;;  %v46_v50 = vld [vmem:[%s1729_s0 + $0xa8] sm:$0xff]  ;;  %v47_v52 = vld [vmem:[%s1729_s0 + $0xb0] sm:$0xff] }
  0x12   :  { %v77_v49 = vld [vmem:[%s1730_s1 + $0xa0] sm:$0xff]  ;;  %v78_v51 = vld [vmem:[%s1730_s1 + $0xa8] sm:$0xff]  ;;  %v79_v53 = vld [vmem:[%s1730_s1 + $0xb0] sm:$0xff] }
  0x13   :  { %980 = vmatmul.mubr.msk.f32.gmra.mxu0 %vm100_vm0, %v30_v18  ;;  %v48_v54 = vld [vmem:[%s1729_s0 + $0xb8] sm:$0xff]  ;;  %v49_v56 = vld [vmem:[%s1729_s0 + $0xc0] sm:$0xff]  ;;  %v50_v58 = vld [vmem:[%s1729_s0 + $0xc8] sm:$0xff] }
  0x14   :  { %1036 = vmatmul.mubr.msk.f32.gmra.mxu1 %vm100_vm0, %v62_v19  ;;  %982 = vmatprep.mubr.msk.f32.mxu0 %vm100_vm0, %v31_v20  ;;  %v80_v55 = vld [vmem:[%s1730_s1 + $0xb8] sm:$0xff]  ;;  %v81_v57 = vld [vmem:[%s1730_s1 + $0xc0] sm:$0xff]  ;;  %v82_v59 = vld [vmem:[%s1730_s1 + $0xc8] sm:$0xff] }
  0x15   :  { %1038 = vmatprep.mubr.msk.f32.mxu1 %vm100_vm0, %v63_v21  ;;  %v51_v60 = vld [vmem:[%s1729_s0 + $0xd0] sm:$0xff]  ;;  %v52_v62 = vld [vmem:[%s1729_s0 + $0xd8] sm:$0xff]  ;;  %v53_v0 = vld [vmem:[%s1729_s0 + $0xe0] sm:$0xff] }
  0x16   :  { %v83_v61 = vld [vmem:[%s1730_s1 + $0xd0] sm:$0xff]  ;;  %v84_v63 = vld [vmem:[%s1730_s1 + $0xd8] sm:$0xff]  ;;  %v85_v1 = vld [vmem:[%s1730_s1 + $0xe0] sm:$0xff] }
  0x17   :  { %983 = vmatmul.mubr.msk.f32.gmra.mxu0 %vm100_vm0, %v32_v22  ;;  %v54_v2 = vld [vmem:[%s1729_s0 + $0xe8] sm:$0xff]  ;;  %v55_v4 = vld [vmem:[%s1729_s0 + $0xf0] sm:$0xff]  ;;  %v56_v6 = vld [vmem:[%s1729_s0 + $0xf8] sm:$0xff] }
  0x18   :  { %1039 = vmatmul.mubr.msk.f32.gmra.mxu1 %vm100_vm0, %v64_v23  ;;  %985 = vmatprep.mubr.msk.f32.mxu0 %vm100_vm0, %v33_v24  ;;  %v86_v3 = vld [vmem:[%s1730_s1 + $0xe8] sm:$0xff]  ;;  %v87_v5 = vld [vmem:[%s1730_s1 + $0xf0] sm:$0xff]  ;;  %v88_v7 = vld [vmem:[%s1730_s1 + $0xf8] sm:$0xff] }
  0x19   :  { %1041 = vmatprep.mubr.msk.f32.mxu1 %vm100_vm0, %v65_v25  ;;  %v1400_v8 = vld [vmem:[%s1731_s3] ss:$0 sm:$0xff] }
  0x1a   :  { %v1405_v9 = vld [vmem:[%s1732_s5] ss:$0 sm:$0xff] }
  0x1b   :  { %986 = vmatmul.mubr.msk.f32.gmra.mxu0 %vm100_vm0, %v34_v26 }
  0x1c   :  { %1042 = vmatmul.mubr.msk.f32.gmra.mxu1 %vm100_vm0, %v66_v27  ;;  %988 = vmatprep.mubr.msk.f32.mxu0 %vm100_vm0, %v35_v28 }
  0x1d   :  { %1044 = vmatprep.mubr.msk.f32.mxu1 %vm100_vm0, %v67_v29 }
  0x1f   :  { %989 = vmatmul.mubr.msk.f32.gmra.mxu0 %vm100_vm0, %v36_v30 }
  0x20   :  { %1045 = vmatmul.mubr.msk.f32.gmra.mxu1 %vm100_vm0, %v68_v31  ;;  %991 = vmatprep.mubr.msk.f32.mxu0 %vm100_vm0, %v37_v32 }
  0x21   :  { %1047 = vmatprep.mubr.msk.f32.mxu1 %vm100_vm0, %v69_v33 }
  0x23   :  { %992 = vmatmul.mubr.msk.f32.gmra.mxu0 %vm100_vm0, %v38_v34 }
  0x24   :  { %1048 = vmatmul.mubr.msk.f32.gmra.mxu1 %vm100_vm0, %v70_v35  ;;  %994 = vmatprep.mubr.msk.f32.mxu0 %vm100_vm0, %v39_v36 }
  0x25   :  { %1050 = vmatprep.mubr.msk.f32.mxu1 %vm100_vm0, %v71_v37 }
  0x27   :  { %995 = vmatmul.mubr.msk.f32.gmra.mxu0 %vm100_vm0, %v40_v38 }
  0x28   :  { %1051 = vmatmul.mubr.msk.f32.gmra.mxu1 %vm100_vm0, %v72_v39  ;;  %997 = vmatprep.mubr.msk.f32.mxu0 %vm100_vm0, %v41_v40 }
  0x29   :  { %1053 = vmatprep.mubr.msk.f32.mxu1 %vm100_vm0, %v73_v41 }
  0x2b   :  { %998 = vmatmul.mubr.msk.f32.gmra.mxu0 %vm100_vm0, %v42_v42 }
  0x2c   :  { %1054 = vmatmul.mubr.msk.f32.gmra.mxu1 %vm100_vm0, %v74_v43  ;;  %1000 = vmatprep.mubr.msk.f32.mxu0 %vm100_vm0, %v43_v44 }
  0x2d   :  { %1056 = vmatprep.mubr.msk.f32.mxu1 %vm100_vm0, %v75_v45 }
  0x2f   :  { %1001 = vmatmul.mubr.msk.f32.gmra.mxu0 %vm100_vm0, %v44_v46 }
  0x30   :  { %1057 = vmatmul.mubr.msk.f32.gmra.mxu1 %vm100_vm0, %v76_v47  ;;  %1003 = vmatprep.mubr.msk.f32.mxu0 %vm100_vm0, %v45_v48 }
  0x31   :  { %1059 = vmatprep.mubr.msk.f32.mxu1 %vm100_vm0, %v77_v49 }
  0x33   :  { %1004 = vmatmul.mubr.msk.f32.gmra.mxu0 %vm100_vm0, %v46_v50 }
  0x34   :  { %1060 = vmatmul.mubr.msk.f32.gmra.mxu1 %vm100_vm0, %v78_v51  ;;  %1006 = vmatprep.mubr.msk.f32.mxu0 %vm100_vm0, %v47_v52 }
  0x35   :  { %1062 = vmatprep.mubr.msk.f32.mxu1 %vm100_vm0, %v79_v53 }
  0x37   :  { %1007 = vmatmul.mubr.msk.f32.gmra.mxu0 %vm100_vm0, %v48_v54 }
  0x38   :  { %1063 = vmatmul.mubr.msk.f32.gmra.mxu1 %vm100_vm0, %v80_v55  ;;  %1009 = vmatprep.mubr.msk.f32.mxu0 %vm100_vm0, %v49_v56 }
  0x39   :  { %1065 = vmatprep.mubr.msk.f32.mxu1 %vm100_vm0, %v81_v57 }
  0x3b   :  { %1010 = vmatmul.mubr.msk.f32.gmra.mxu0 %vm100_vm0, %v50_v58 }
  0x3c   :  { %1066 = vmatmul.mubr.msk.f32.gmra.mxu1 %vm100_vm0, %v82_v59  ;;  %1012 = vmatprep.mubr.msk.f32.mxu0 %vm100_vm0, %v51_v60 }
  0x3d   :  { %1068 = vmatprep.mubr.msk.f32.mxu1 %vm100_vm0, %v83_v61 }
  0x3f   :  { %1013 = vmatmul.mubr.msk.f32.gmra.mxu0 %vm100_vm0, %v52_v62 }
  0x40   :  { %1069 = vmatmul.mubr.msk.f32.gmra.mxu1 %vm100_vm0, %v84_v63  ;;  %1015 = vmatprep.mubr.msk.f32.mxu0 %vm100_vm0, %v53_v0 }
  0x41   :  { %1071 = vmatprep.mubr.msk.f32.mxu1 %vm100_vm0, %v85_v1 }
  0x43   :  { %1016 = vmatmul.mubr.msk.f32.gmra.mxu0 %vm100_vm0, %v54_v2 }
  0x44   :  { %1072 = vmatmul.mubr.msk.f32.gmra.mxu1 %vm100_vm0, %v86_v3  ;;  %1018 = vmatprep.mubr.msk.f32.mxu0 %vm100_vm0, %v55_v4 }
  0x45   :  { %1074 = vmatprep.mubr.msk.f32.mxu1 %vm100_vm0, %v87_v5 }
  0x47   :  { %1019 = vmatmul.mubr.msk.f32.gmra.mxu0 %vm100_vm0, %v56_v6 }
  0x48   :  { %1075 = vmatmul.mubr.msk.f32.gmra.mxu1 %vm100_vm0, %v88_v7 }
  0xcb   :  { %v975_v10 = vpop.f32.mrf.mxu0 }
  0xcc   :  { %v1031_v11 = vpop.f32.mrf.mxu1  ;;  %v269_v12 = vadd.f32 %v975_v10, %v1400_v8 }
  0xcd   :  { %v601_v13 = vadd.f32 %v1031_v11, %v1405_v9  ;;  %v263_v14 = vpop.f32.mrf.mxu0 }
  0xce   :  { %v595_v15 = vpop.f32.mrf.mxu1  ;;  %756 = vst.msk [vmem:[%s1733_s6 + $0x8] sm:$0xff] %vm754_vm1, %v269_v12  ;;  %v264_v16 = vadd.f32 %v1400_v8, %v263_v14 }
  0xcf   :  { %788 = vst.msk [vmem:[%s1734_s7 + $0x8] sm:$0xff] %vm100_vm0, %v601_v13  ;;  %v596_v17 = vadd.f32 %v1405_v9, %v595_v15  ;;  %v978_v18 = vpop.f32.mrf.mxu0 }
  0xd0   :  { %v1034_v19 = vpop.f32.mrf.mxu1  ;;  %755 = vst.msk [vmem:[%s1733_s6] sm:$0xff] %vm754_vm1, %v264_v16  ;;  %v279_v20 = vadd.f32 %v978_v18, %v1400_v8 }
  0xd1   :  { %787 = vst.msk [vmem:[%s1734_s7] sm:$0xff] %vm100_vm0, %v596_v17  ;;  %v611_v21 = vadd.f32 %v1034_v19, %v1405_v9  ;;  %v273_v22 = vpop.f32.mrf.mxu0 }
  0xd2   :  { %v605_v23 = vpop.f32.mrf.mxu1  ;;  %758 = vst.msk [vmem:[%s1733_s6 + $0x18] sm:$0xff] %vm754_vm1, %v279_v20  ;;  %v274_v24 = vadd.f32 %v1400_v8, %v273_v22 }
  0xd3   :  { %790 = vst.msk [vmem:[%s1734_s7 + $0x18] sm:$0xff] %vm100_vm0, %v611_v21  ;;  %v606_v25 = vadd.f32 %v1405_v9, %v605_v23  ;;  %v981_v26 = vpop.f32.mrf.mxu0 }
  0xd4   :  { %v1037_v27 = vpop.f32.mrf.mxu1  ;;  %757 = vst.msk [vmem:[%s1733_s6 + $0x10] sm:$0xff] %vm754_vm1, %v274_v24  ;;  %v289_v28 = vadd.f32 %v981_v26, %v1400_v8 }
  0xd5   :  { %789 = vst.msk [vmem:[%s1734_s7 + $0x10] sm:$0xff] %vm100_vm0, %v606_v25  ;;  %v621_v29 = vadd.f32 %v1037_v27, %v1405_v9  ;;  %v283_v30 = vpop.f32.mrf.mxu0 }
  0xd6   :  { %v615_v31 = vpop.f32.mrf.mxu1  ;;  %760 = vst.msk [vmem:[%s1733_s6 + $0x28] sm:$0xff] %vm754_vm1, %v289_v28  ;;  %v284_v32 = vadd.f32 %v1400_v8, %v283_v30 }
  0xd7   :  { %792 = vst.msk [vmem:[%s1734_s7 + $0x28] sm:$0xff] %vm100_vm0, %v621_v29  ;;  %v616_v33 = vadd.f32 %v1405_v9, %v615_v31  ;;  %v984_v34 = vpop.f32.mrf.mxu0 }
  0xd8   :  { %v1040_v35 = vpop.f32.mrf.mxu1  ;;  %759 = vst.msk [vmem:[%s1733_s6 + $0x20] sm:$0xff] %vm754_vm1, %v284_v32  ;;  %v299_v36 = vadd.f32 %v984_v34, %v1400_v8 }
  0xd9   :  { %791 = vst.msk [vmem:[%s1734_s7 + $0x20] sm:$0xff] %vm100_vm0, %v616_v33  ;;  %v631_v37 = vadd.f32 %v1040_v35, %v1405_v9  ;;  %v293_v38 = vpop.f32.mrf.mxu0 }
  0xda   :  { %v625_v39 = vpop.f32.mrf.mxu1  ;;  %762 = vst.msk [vmem:[%s1733_s6 + $0x38] sm:$0xff] %vm754_vm1, %v299_v36  ;;  %v294_v40 = vadd.f32 %v1400_v8, %v293_v38 }
  0xdb   :  { %794 = vst.msk [vmem:[%s1734_s7 + $0x38] sm:$0xff] %vm100_vm0, %v631_v37  ;;  %v626_v41 = vadd.f32 %v1405_v9, %v625_v39  ;;  %v987_v42 = vpop.f32.mrf.mxu0 }
  0xdc   :  { %v1043_v43 = vpop.f32.mrf.mxu1  ;;  %761 = vst.msk [vmem:[%s1733_s6 + $0x30] sm:$0xff] %vm754_vm1, %v294_v40  ;;  %v309_v44 = vadd.f32 %v987_v42, %v1400_v8 }
  0xdd   :  { %793 = vst.msk [vmem:[%s1734_s7 + $0x30] sm:$0xff] %vm100_vm0, %v626_v41  ;;  %v641_v45 = vadd.f32 %v1043_v43, %v1405_v9  ;;  %v303_v46 = vpop.f32.mrf.mxu0 }
  0xde   :  { %v635_v47 = vpop.f32.mrf.mxu1  ;;  %764 = vst.msk [vmem:[%s1733_s6 + $0x48] sm:$0xff] %vm754_vm1, %v309_v44  ;;  %v304_v48 = vadd.f32 %v1400_v8, %v303_v46 }
  0xdf   :  { %796 = vst.msk [vmem:[%s1734_s7 + $0x48] sm:$0xff] %vm100_vm0, %v641_v45  ;;  %v636_v49 = vadd.f32 %v1405_v9, %v635_v47  ;;  %v990_v50 = vpop.f32.mrf.mxu0 }
  0xe0   :  { %v1046_v51 = vpop.f32.mrf.mxu1  ;;  %763 = vst.msk [vmem:[%s1733_s6 + $0x40] sm:$0xff] %vm754_vm1, %v304_v48  ;;  %v319_v52 = vadd.f32 %v990_v50, %v1400_v8 }
  0xe1   :  { %795 = vst.msk [vmem:[%s1734_s7 + $0x40] sm:$0xff] %vm100_vm0, %v636_v49  ;;  %v651_v53 = vadd.f32 %v1046_v51, %v1405_v9  ;;  %v313_v54 = vpop.f32.mrf.mxu0 }
  0xe2   :  { %v645_v55 = vpop.f32.mrf.mxu1  ;;  %766 = vst.msk [vmem:[%s1733_s6 + $0x58] sm:$0xff] %vm754_vm1, %v319_v52  ;;  %v314_v56 = vadd.f32 %v1400_v8, %v313_v54 }
  0xe3   :  { %798 = vst.msk [vmem:[%s1734_s7 + $0x58] sm:$0xff] %vm100_vm0, %v651_v53  ;;  %v646_v57 = vadd.f32 %v1405_v9, %v645_v55  ;;  %v993_v58 = vpop.f32.mrf.mxu0 }
  0xe4   :  { %v1049_v59 = vpop.f32.mrf.mxu1  ;;  %765 = vst.msk [vmem:[%s1733_s6 + $0x50] sm:$0xff] %vm754_vm1, %v314_v56  ;;  %v329_v60 = vadd.f32 %v993_v58, %v1400_v8 }
  0xe5   :  { %797 = vst.msk [vmem:[%s1734_s7 + $0x50] sm:$0xff] %vm100_vm0, %v646_v57  ;;  %v661_v61 = vadd.f32 %v1049_v59, %v1405_v9  ;;  %v323_v62 = vpop.f32.mrf.mxu0 }
  0xe6   :  { %v655_v63 = vpop.f32.mrf.mxu1  ;;  %768 = vst.msk [vmem:[%s1733_s6 + $0x68] sm:$0xff] %vm754_vm1, %v329_v60  ;;  %v324_v0 = vadd.f32 %v1400_v8, %v323_v62 }
  0xe7   :  { %800 = vst.msk [vmem:[%s1734_s7 + $0x68] sm:$0xff] %vm100_vm0, %v661_v61  ;;  %v656_v1 = vadd.f32 %v1405_v9, %v655_v63  ;;  %v996_v2 = vpop.f32.mrf.mxu0 }
  0xe8   :  { %v1052_v3 = vpop.f32.mrf.mxu1  ;;  %767 = vst.msk [vmem:[%s1733_s6 + $0x60] sm:$0xff] %vm754_vm1, %v324_v0  ;;  %v339_v4 = vadd.f32 %v996_v2, %v1400_v8 }
  0xe9   :  { %799 = vst.msk [vmem:[%s1734_s7 + $0x60] sm:$0xff] %vm100_vm0, %v656_v1  ;;  %v671_v5 = vadd.f32 %v1052_v3, %v1405_v9  ;;  %v333_v6 = vpop.f32.mrf.mxu0 }
  0xea   :  { %v665_v7 = vpop.f32.mrf.mxu1  ;;  %770 = vst.msk [vmem:[%s1733_s6 + $0x78] sm:$0xff] %vm754_vm1, %v339_v4  ;;  %v334_v10 = vadd.f32 %v1400_v8, %v333_v6 }
  0xeb   :  { %802 = vst.msk [vmem:[%s1734_s7 + $0x78] sm:$0xff] %vm100_vm0, %v671_v5  ;;  %v666_v11 = vadd.f32 %v1405_v9, %v665_v7  ;;  %v999_v12 = vpop.f32.mrf.mxu0 }
  0xec   :  { %v1055_v13 = vpop.f32.mrf.mxu1  ;;  %769 = vst.msk [vmem:[%s1733_s6 + $0x70] sm:$0xff] %vm754_vm1, %v334_v10  ;;  %v349_v14 = vadd.f32 %v999_v12, %v1400_v8 }
  0xed   :  { %801 = vst.msk [vmem:[%s1734_s7 + $0x70] sm:$0xff] %vm100_vm0, %v666_v11  ;;  %v681_v15 = vadd.f32 %v1055_v13, %v1405_v9  ;;  %v343_v16 = vpop.f32.mrf.mxu0 }
  0xee   :  { %v675_v17 = vpop.f32.mrf.mxu1  ;;  %772 = vst.msk [vmem:[%s1733_s6 + $0x88] sm:$0xff] %vm754_vm1, %v349_v14  ;;  %v344_v18 = vadd.f32 %v1400_v8, %v343_v16 }
  0xef   :  { %804 = vst.msk [vmem:[%s1734_s7 + $0x88] sm:$0xff] %vm100_vm0, %v681_v15  ;;  %v676_v19 = vadd.f32 %v1405_v9, %v675_v17  ;;  %v1002_v20 = vpop.f32.mrf.mxu0 }
  0xf0   :  { %v1058_v21 = vpop.f32.mrf.mxu1  ;;  %771 = vst.msk [vmem:[%s1733_s6 + $0x80] sm:$0xff] %vm754_vm1, %v344_v18  ;;  %v359_v22 = vadd.f32 %v1002_v20, %v1400_v8 }
  0xf1   :  { %803 = vst.msk [vmem:[%s1734_s7 + $0x80] sm:$0xff] %vm100_vm0, %v676_v19  ;;  %v691_v23 = vadd.f32 %v1058_v21, %v1405_v9  ;;  %v353_v24 = vpop.f32.mrf.mxu0 }
  0xf2   :  { %v685_v25 = vpop.f32.mrf.mxu1  ;;  %774 = vst.msk [vmem:[%s1733_s6 + $0x98] sm:$0xff] %vm754_vm1, %v359_v22  ;;  %v354_v26 = vadd.f32 %v1400_v8, %v353_v24 }
  0xf3   :  { %806 = vst.msk [vmem:[%s1734_s7 + $0x98] sm:$0xff] %vm100_vm0, %v691_v23  ;;  %v686_v27 = vadd.f32 %v1405_v9, %v685_v25  ;;  %v1005_v28 = vpop.f32.mrf.mxu0 }
  0xf4   :  { %v1061_v29 = vpop.f32.mrf.mxu1  ;;  %773 = vst.msk [vmem:[%s1733_s6 + $0x90] sm:$0xff] %vm754_vm1, %v354_v26  ;;  %v369_v30 = vadd.f32 %v1005_v28, %v1400_v8 }
  0xf5   :  { %805 = vst.msk [vmem:[%s1734_s7 + $0x90] sm:$0xff] %vm100_vm0, %v686_v27  ;;  %v701_v31 = vadd.f32 %v1061_v29, %v1405_v9  ;;  %v363_v32 = vpop.f32.mrf.mxu0 }
  0xf6   :  { %v695_v33 = vpop.f32.mrf.mxu1  ;;  %776 = vst.msk [vmem:[%s1733_s6 + $0xa8] sm:$0xff] %vm754_vm1, %v369_v30  ;;  %v364_v34 = vadd.f32 %v1400_v8, %v363_v32 }
  0xf7   :  { %808 = vst.msk [vmem:[%s1734_s7 + $0xa8] sm:$0xff] %vm100_vm0, %v701_v31  ;;  %v696_v35 = vadd.f32 %v1405_v9, %v695_v33  ;;  %v1008_v36 = vpop.f32.mrf.mxu0 }
  0xf8   :  { %v1064_v37 = vpop.f32.mrf.mxu1  ;;  %775 = vst.msk [vmem:[%s1733_s6 + $0xa0] sm:$0xff] %vm754_vm1, %v364_v34  ;;  %v379_v38 = vadd.f32 %v1008_v36, %v1400_v8 }
  0xf9   :  { %807 = vst.msk [vmem:[%s1734_s7 + $0xa0] sm:$0xff] %vm100_vm0, %v696_v35  ;;  %v711_v39 = vadd.f32 %v1064_v37, %v1405_v9  ;;  %v373_v40 = vpop.f32.mrf.mxu0 }
  0xfa   :  { %v705_v41 = vpop.f32.mrf.mxu1  ;;  %778 = vst.msk [vmem:[%s1733_s6 + $0xb8] sm:$0xff] %vm754_vm1, %v379_v38  ;;  %v374_v42 = vadd.f32 %v1400_v8, %v373_v40 }
  0xfb   :  { %810 = vst.msk [vmem:[%s1734_s7 + $0xb8] sm:$0xff] %vm100_vm0, %v711_v39  ;;  %v706_v43 = vadd.f32 %v1405_v9, %v705_v41  ;;  %v1011_v44 = vpop.f32.mrf.mxu0 }
  0xfc   :  { %v1067_v45 = vpop.f32.mrf.mxu1  ;;  %777 = vst.msk [vmem:[%s1733_s6 + $0xb0] sm:$0xff] %vm754_vm1, %v374_v42  ;;  %v389_v46 = vadd.f32 %v1011_v44, %v1400_v8 }
  0xfd   :  { %809 = vst.msk [vmem:[%s1734_s7 + $0xb0] sm:$0xff] %vm100_vm0, %v706_v43  ;;  %v721_v47 = vadd.f32 %v1067_v45, %v1405_v9  ;;  %v383_v48 = vpop.f32.mrf.mxu0 }
  0xfe   :  { %v715_v49 = vpop.f32.mrf.mxu1  ;;  %780 = vst.msk [vmem:[%s1733_s6 + $0xc8] sm:$0xff] %vm754_vm1, %v389_v46  ;;  %v384_v50 = vadd.f32 %v1400_v8, %v383_v48 }
  0xff   :  { %812 = vst.msk [vmem:[%s1734_s7 + $0xc8] sm:$0xff] %vm100_vm0, %v721_v47  ;;  %v716_v51 = vadd.f32 %v1405_v9, %v715_v49  ;;  %v1014_v52 = vpop.f32.mrf.mxu0 }
 0x100   :  { %v1070_v53 = vpop.f32.mrf.mxu1  ;;  %779 = vst.msk [vmem:[%s1733_s6 + $0xc0] sm:$0xff] %vm754_vm1, %v384_v50  ;;  %v399_v54 = vadd.f32 %v1014_v52, %v1400_v8 }
 0x101   :  { %811 = vst.msk [vmem:[%s1734_s7 + $0xc0] sm:$0xff] %vm100_vm0, %v716_v51  ;;  %v731_v55 = vadd.f32 %v1070_v53, %v1405_v9  ;;  %v393_v56 = vpop.f32.mrf.mxu0 }
 0x102   :  { %v725_v57 = vpop.f32.mrf.mxu1  ;;  %782 = vst.msk [vmem:[%s1733_s6 + $0xd8] sm:$0xff] %vm754_vm1, %v399_v54  ;;  %v394_v58 = vadd.f32 %v1400_v8, %v393_v56 }
 0x103   :  { %814 = vst.msk [vmem:[%s1734_s7 + $0xd8] sm:$0xff] %vm100_vm0, %v731_v55  ;;  %v726_v59 = vadd.f32 %v1405_v9, %v725_v57  ;;  %v1017_v60 = vpop.f32.mrf.mxu0 }
 0x104   :  { %v1073_v61 = vpop.f32.mrf.mxu1  ;;  %781 = vst.msk [vmem:[%s1733_s6 + $0xd0] sm:$0xff] %vm754_vm1, %v394_v58  ;;  %v409_v62 = vadd.f32 %v1017_v60, %v1400_v8 }
 0x105   :  { %813 = vst.msk [vmem:[%s1734_s7 + $0xd0] sm:$0xff] %vm100_vm0, %v726_v59  ;;  %v741_v63 = vadd.f32 %v1073_v61, %v1405_v9  ;;  %v403_v0 = vpop.f32.mrf.mxu0 }
 0x106   :  { %v735_v1 = vpop.f32.mrf.mxu1  ;;  %784 = vst.msk [vmem:[%s1733_s6 + $0xe8] sm:$0xff] %vm754_vm1, %v409_v62  ;;  %v404_v2 = vadd.f32 %v1400_v8, %v403_v0 }
 0x107   :  { %816 = vst.msk [vmem:[%s1734_s7 + $0xe8] sm:$0xff] %vm100_vm0, %v741_v63  ;;  %v736_v3 = vadd.f32 %v1405_v9, %v735_v1  ;;  %v1020_v4 = vpop.f32.mrf.mxu0 }
 0x108   :  { %v1076_v5 = vpop.f32.mrf.mxu1  ;;  %783 = vst.msk [vmem:[%s1733_s6 + $0xe0] sm:$0xff] %vm754_vm1, %v404_v2  ;;  %v419_v6 = vadd.f32 %v1020_v4, %v1400_v8 }
 0x109   :  { %815 = vst.msk [vmem:[%s1734_s7 + $0xe0] sm:$0xff] %vm100_vm0, %v736_v3  ;;  %v751_v7 = vadd.f32 %v1076_v5, %v1405_v9  ;;  %v413_v10 = vpop.f32.mrf.mxu0 }
 0x10a   :  { %v745_v11 = vpop.f32.mrf.mxu1  ;;  %786 = vst.msk [vmem:[%s1733_s6 + $0xf8] sm:$0xff] %vm754_vm1, %v419_v6  ;;  %v414_v12 = vadd.f32 %v1400_v8, %v413_v10 }
 0x10b   :  { %818 = vst.msk [vmem:[%s1734_s7 + $0xf8] sm:$0xff] %vm100_vm0, %v751_v7  ;;  %v746_v13 = vadd.f32 %v1405_v9, %v745_v11 }
 0x10c   :  { %785 = vst.msk [vmem:[%s1733_s6 + $0xf0] sm:$0xff] %vm754_vm1, %v414_v12 }
 0x10d   :  { %817 = vst.msk [vmem:[%s1734_s7 + $0xf0] sm:$0xff] %vm100_vm0, %v746_v13 }

</bundles_post_ra>
